<compile_context>
chip_gen: v6e
topology: v6e:2x2x1
jax: 0.10.0
libtpu: 0.0.40
codegen_flags: <defaults>
</compile_context>

<pallas_src>
import functools

import jax
import jax.numpy as jnp
from jax.experimental import pallas as pl
from jax.experimental.pallas import tpu as pltpu


# ----------------------------- per-generation VMEM budget -------------------------- #

@functools.lru_cache(maxsize=None)
def _vmem_limit_bytes():
    """Scoped-VMEM limit per generation: ~96 MiB on v5e/v6e (128 MiB parts), 48 MiB on
    v7x (64 MiB part).  Falls back to 48 MiB if the query is unavailable."""
    cap = 64 * 1024 * 1024
    try:
        info = pltpu.get_tpu_info()
        cap = int(getattr(info, "vmem_capacity_bytes", cap))
    except Exception:
        pass
    return int(min((cap * 3) // 4, 100 * 1024 * 1024))


def _compiler_params(dimension_semantics):
    return pltpu.CompilerParams(
        dimension_semantics=dimension_semantics,
        vmem_limit_bytes=_vmem_limit_bytes(),
    )


# --------------------------- 1x1 lateral conv kernels ------------------------------ #

def _conv1x1_kernel(x_ref, w_ref, b_ref, o_ref):
    # x_ref: (1, TH, W, Cin) bf16   w_ref: (Cin, Cout) bf16   b_ref: (1, Cout) f32
    _, TH, W, Cin = x_ref.shape
    Cout = w_ref.shape[1]
    x = x_ref[0].reshape(TH * W, Cin)
    y = jnp.dot(x, w_ref[...], preferred_element_type=jnp.float32) + b_ref[...]
    o_ref[0] = y.reshape(TH, W, Cout).astype(o_ref.dtype)


def _conv1x1_up_add_kernel(x_ref, w_ref, b_ref, r_ref, o_ref):
    # Same, fused with `out += nearest_upsample_2x(residual)`; the residual arrives at
    # COARSE resolution (TH/2, W/2) and is broadcast-expanded in vregs (never hits HBM
    # at fine resolution).
    _, TH, W, Cin = x_ref.shape
    Cout = w_ref.shape[1]
    _, THc, Wc, _ = r_ref.shape          # TH == 2*THc, W == 2*Wc
    x = x_ref[0].reshape(TH * W, Cin)
    y = jnp.dot(x, w_ref[...], preferred_element_type=jnp.float32) + b_ref[...]
    y = y.reshape(TH, W, Cout)

    r = r_ref[0].astype(jnp.float32)                                      # (THc, Wc, F)
    r_w = jnp.broadcast_to(r[:, :, None, :], (THc, Wc, 2, Cout)).reshape(THc, W, Cout)
    r_up = jnp.broadcast_to(r_w[:, None, :, :], (THc, 2, W, Cout)).reshape(TH, W, Cout)

    o_ref[0] = (y + r_up).astype(o_ref.dtype)


def _pick_conv1x1_row_tile(H, W, Cin, Cout, with_residual):
    """Largest divisor of H whose (double-buffered) blocks + temps fit the VMEM budget."""
    budget = (_vmem_limit_bytes() * 3) // 5
    cands = [t for t in range(H, 0, -1)
             if H % t == 0 and (not with_residual or t % 2 == 0)]
    for th in cands:
        use = (2 * th * W * Cin * 2            # bf16 input blocks (double-buffered)
               + 2 * Cin * Cout * 2            # bf16 weight blocks
               + 2 * th * W * Cout * 2         # bf16 output blocks
               + th * W * Cin * 2              # loaded x value
               + 2 * th * W * Cout * 4)        # y / upsampled-residual f32 temps
        if with_residual:
            use += 2 * (th // 2) * (W // 2) * Cout * 2
        if use <= budget:
            return th
    return cands[-1]


def conv1x1(x, w, b, residual=None):
    """1x1 conv + bias, optionally fused with `out += nearest_upsample_2x(residual)`.

    x: (N, H, W, Cin) NHWC (cast to bf16); w: (Cin, Cout) bf16; b: (1, Cout) f32.
    residual (optional): (N, H//2, W//2, Cout) coarse top-down feature (bf16).
    Output: (N, H, W, Cout) bf16 (internal activation).
    """
    if x.dtype != jnp.bfloat16:
        x = x.astype(jnp.bfloat16)
    N, H, W, Cin = x.shape
    Cout = w.shape[1]
    need_res = residual is not None
    if need_res:
        assert H % 2 == 0 and W % 2 == 0, (H, W)
        assert residual.shape == (N, H // 2, W // 2, Cout), residual.shape
        if residual.dtype != jnp.bfloat16:
            residual = residual.astype(jnp.bfloat16)

    TH = _pick_conv1x1_row_tile(H, W, Cin, Cout, need_res)
    grid = (N, H // TH)

    in_specs = [
        pl.BlockSpec((1, TH, W, Cin), lambda n, i: (n, i, 0, 0)),
        pl.BlockSpec((Cin, Cout), lambda n, i: (0, 0)),
        pl.BlockSpec((1, Cout), lambda n, i: (0, 0)),
    ]
    args = [x, w, b]
    kern = _conv1x1_kernel
    if need_res:
        in_specs.append(
            pl.BlockSpec((1, TH // 2, W // 2, Cout), lambda n, i: (n, i, 0, 0)))
        args.append(residual)
        kern = _conv1x1_up_add_kernel

    return pl.pallas_call(
        kern,
        out_shape=jax.ShapeDtypeStruct((N, H, W, Cout), jnp.bfloat16),
        grid=grid,
        in_specs=in_specs,
        out_specs=pl.BlockSpec((1, TH, W, Cout), lambda n, i: (n, i, 0, 0)),
        compiler_params=_compiler_params(("parallel", "parallel")),
    )(*args)


# ------------------------------ 3x3 conv kernel ------------------------------------ #

def _conv3x3_kernel(x_hbm, w_ref, b_ref, o_ref, xbuf, sems, *, stride, relu_input):
    # x_hbm: (N, H, W, Cin) bf16, left in HBM (memory_space=pl.ANY).
    # w_ref: (3, 3*Cin, Cout) bf16 (kw taps folded into the contraction).
    # b_ref: (1, Cout) f32.   o_ref: (1, THo, Wo, Cout) f32.
    # xbuf : VMEM (2, TH+2, W+2, Cin) bf16 -- double-buffered halo slab (manual DMA).
    # sems : DMA semaphores (2, 3)         -- (slot, {body, top-halo, bottom-halo}).
    n = pl.program_id(0)
    i = pl.program_id(1)
    n_tiles = pl.num_programs(1)
    _, H, W, Cin = x_hbm.shape
    TH = xbuf.shape[1] - 2
    _, THo, Wo, Cout = o_ref.shape
    slot = i % 2

    def tile_copies(tile, slot_):
        # Slab row k holds input row tile*TH - 1 + k.  Halo rows are clamped at the
        # image edges (then overwritten with zeros below), keeping all DMA shapes static.
        r0 = tile * TH
        top = jnp.maximum(r0 - 1, 0)
        bot = jnp.minimum(r0 + TH, H - 1)
        return (
            pltpu.make_async_copy(x_hbm.at[n, pl.ds(r0, TH)],
                                  xbuf.at[slot_, pl.ds(1, TH), pl.ds(1, W)],
                                  sems.at[slot_, 0]),
            pltpu.make_async_copy(x_hbm.at[n, pl.ds(top, 1)],
                                  xbuf.at[slot_, pl.ds(0, 1), pl.ds(1, W)],
                                  sems.at[slot_, 1]),
            pltpu.make_async_copy(x_hbm.at[n, pl.ds(bot, 1)],
                                  xbuf.at[slot_, pl.ds(TH + 1, 1), pl.ds(1, W)],
                                  sems.at[slot_, 2]),
        )

    @pl.when(i == 0)
    def _():                                 # prime the pipeline for this image
        for cp in tile_copies(i, slot):
            cp.start()

    for cp in tile_copies(i, slot):          # wait for the current tile's slab
        cp.wait()

    @pl.when(i + 1 < n_tiles)
    def _():                                 # prefetch next row tile into the other slot
        for cp in tile_copies(i + 1, 1 - slot):
            cp.start()

    # Border-only zeroing (no full-slab zero pass): the interior is fully DMA-overwritten
    # every step; only the 1-pixel ring needs zeros, and the top/bottom row strips only
    # at the image edges (clamped halo DMAs wrote junk there).
    zero_col = jnp.zeros((TH + 2, 1, Cin), xbuf.dtype)
    xbuf[slot, :, 0:1, :] = zero_col
    xbuf[slot, :, W + 1:W + 2, :] = zero_col
    zero_row = jnp.zeros((1, W + 2, Cin), xbuf.dtype)

    @pl.when(i == 0)
    def _():
        xbuf[slot, 0:1, :, :] = zero_row

    @pl.when(i == n_tiles - 1)
    def _():
        xbuf[slot, TH + 1:TH + 2, :, :] = zero_row

    slab = xbuf[slot]                        # (TH+2, W+2, Cin) bf16
    if relu_input:
        # Halo ring is zero and relu(0) == 0, so relu on the whole slab is exact.
        slab = jnp.maximum(slab, 0.0)

    M = THo * Wo
    # Accumulator initialised with the broadcast bias: no separate bias epilogue pass.
    acc = jnp.broadcast_to(b_ref[...], (M, Cout)).astype(jnp.float32)

    for kh in range(3):
        if stride == 1:
            rows = slab[kh:kh + THo]                                   # (THo, W+2, Cin)
        else:
            # Even/odd row de-interleave: output row q needs slab row 2q + kh.
            xpr = slab.reshape((TH + 2) // 2, 2, W + 2, Cin)
            rows = xpr[kh // 2:kh // 2 + THo, kh & 1]                  # (THo, W+2, Cin)
        # Fold the 3 kw taps into the contraction: K = 3 * Cin.
        lhs = jnp.concatenate(
            [rows[:, 0:W], rows[:, 1:W + 1], rows[:, 2:W + 2]], axis=-1)
        lhs = lhs.reshape(THo * W, 3 * Cin)
        if stride == 2:
            # Column stride: keep even output columns BEFORE the matmul (halves M).
            lhs = lhs.reshape(M, 2, 3 * Cin)[:, 0, :]
        acc = acc + jnp.dot(lhs, w_ref[kh], preferred_element_type=jnp.float32)

    o_ref[0] = acc.reshape(THo, Wo, Cout).astype(o_ref.dtype)


def _pick_conv3x3_row_tile(H, W, Cin, Cout, stride):
    """Largest divisor TH of H (even for stride 2) whose working set fits the budget."""
    budget = (_vmem_limit_bytes() * 3) // 5
    wo = (W - 1) // stride + 1
    cands = [t for t in range(H, 0, -1)
             if H % t == 0 and (stride == 1 or t % 2 == 0)]
    for th in cands:
        tho = th // stride
        use = (2 * (th + 2) * (W + 2) * Cin * 2     # double-buffered bf16 halo slabs
               + 2 * 3 * 3 * Cin * Cout * 2         # bf16 weight blocks
               + 2 * tho * wo * Cout * 4            # f32 output blocks
               + (th + 2) * (W + 2) * Cin * 2       # loaded slab value
               + tho * W * 3 * Cin * 2              # lhs temp (bf16)
               + 2 * tho * wo * Cout * 4)           # accumulator / epilogue temps
        if use <= budget:
            return th
    return cands[-1]


def conv3x3(x, w, b, *, stride=1, relu_input=False, row_tile=None):
    """3x3 conv, pad=1, stride in {1, 2}.  x: NHWC (cast to bf16); w: (3,3,Cin,Cout) bf16.

    Row-tiled over H with a manually DMA'd (TH+2)-row halo slab; output is f32 (module
    output dtype)."""
    assert stride in (1, 2)
    if x.dtype != jnp.bfloat16:
        x = x.astype(jnp.bfloat16)
    N, H, W, Cin = x.shape
    Cout = w.shape[-1]

    if stride == 2 and (H % 2 or W % 2):
        # Even-ify H/W with a zero row/col on the far edge (those positions are the
        # conv's zero padding anyway); keeps the in-kernel parity de-interleave simple.
        He, We = H + (H % 2), W + (W % 2)
        x = jnp.pad(x, ((0, 0), (0, He - H), (0, We - W), (0, 0)))
        H, W = He, We

    Ho = (H - 1) // stride + 1
    Wo = (W - 1) // stride + 1
    TH = row_tile if row_tile is not None else _pick_conv3x3_row_tile(H, W, Cin, Cout, stride)
    assert H % TH == 0 and (stride == 1 or TH % 2 == 0), (H, TH, stride)
    THo = TH // stride

    wf = w.reshape(3, 3 * Cin, Cout)          # fold (kw, ci) -> K = 3*Cin
    kern = functools.partial(_conv3x3_kernel, stride=stride, relu_input=relu_input)

    return pl.pallas_call(
        kern,
        out_shape=jax.ShapeDtypeStruct((N, Ho, Wo, Cout), jnp.float32),
        grid=(N, H // TH),
        in_specs=[
            pl.BlockSpec(memory_space=pl.ANY),                      # raw HBM, manual DMA
            pl.BlockSpec((3, 3 * Cin, Cout), lambda n, i: (0, 0, 0)),
            pl.BlockSpec((1, Cout), lambda n, i: (0, 0)),
        ],
        out_specs=pl.BlockSpec((1, THo, Wo, Cout), lambda n, i: (n, i, 0, 0)),
        scratch_shapes=[
            pltpu.VMEM((2, TH + 2, W + 2, Cin), jnp.bfloat16),
            pltpu.SemaphoreType.DMA((2, 3)),
        ],
        compiler_params=_compiler_params(("parallel", "arbitrary")),
    )(x, wf, b)


# --------------------------- Module forward pass ------------------------------------ #

def init_params(key, C3_size, C4_size, C5_size, feature_size):
    specs = {
        "P5_1": (1, 1, C5_size, feature_size),
        "P5_2": (3, 3, feature_size, feature_size),
        "P4_1": (1, 1, C4_size, feature_size),
        "P4_2": (3, 3, feature_size, feature_size),
        "P3_1": (1, 1, C3_size, feature_size),
        "P3_2": (3, 3, feature_size, feature_size),
        "P6":   (3, 3, C5_size, feature_size),
        "P7_2": (3, 3, feature_size, feature_size),
    }
    params = {}
    keys = jax.random.split(key, 2 * len(specs))
    for i, (name, shape) in enumerate(specs.items()):
        kh, kw, cin, cout = shape
        bound = 1.0 / float((kh * kw * cin) ** 0.5)   # torch-like kaiming-uniform bound
        w = jax.random.uniform(keys[2 * i], shape, jnp.float32, -bound, bound)
        b = jax.random.uniform(keys[2 * i + 1], (1, cout), jnp.float32, -bound, bound)
        if kh == 1:
            w = w.reshape(cin, cout)
        params[name + "_w"] = w.astype(jnp.bfloat16)  # MXU input dtype; halves weight HBM
        params[name + "_b"] = b                       # f32 epilogue on the VPU
    return params


def pyramid_features_nhwc(inputs_nhwc, params):
    """Core NHWC pipeline (no transposes); inter-level laterals stored bf16 in HBM."""
    C3, C4, C5 = [t.astype(jnp.bfloat16) for t in inputs_nhwc]

    P5_x = conv1x1(C5, params["P5_1_w"], params["P5_1_b"])                 # bf16 lateral
    P5_out = conv3x3(P5_x, params["P5_2_w"], params["P5_2_b"])

    P4_x = conv1x1(C4, params["P4_1_w"], params["P4_1_b"], residual=P5_x)  # fused 2x up+add
    P4_out = conv3x3(P4_x, params["P4_2_w"], params["P4_2_b"])

    P3_x = conv1x1(C3, params["P3_1_w"], params["P3_1_b"], residual=P4_x)
    P3_out = conv3x3(P3_x, params["P3_2_w"], params["P3_2_b"])

    P6_out = conv3x3(C5, params["P6_w"], params["P6_b"], stride=2)
    P7_out = conv3x3(P6_out, params["P7_2_w"], params["P7_2_b"], stride=2, relu_input=True)

    return [P3_out, P4_out, P5_out, P6_out, P7_out]


def pyramid_features(inputs_nchw, params):
    """NCHW interface matching the PyTorch module (transposes kept only for parity)."""
    inputs_nhwc = [jnp.transpose(t, (0, 2, 3, 1)) for t in inputs_nchw]
    outs = pyramid_features_nhwc(inputs_nhwc, params)
    return [jnp.transpose(t, (0, 3, 1, 2)) for t in outs]


# ----------------------------- Pure-JAX reference ----------------------------------- #

def upsample2x(x):
    N, H, W, C = x.shape
    return jnp.broadcast_to(
        x[:, :, None, :, None, :], (N, H, 2, W, 2, C)).reshape(N, 2 * H, 2 * W, C)


def _conv_ref(x, w, b, stride, pad):
    y = jax.lax.conv_general_dilated(
        x.astype(jnp.bfloat16), w, (stride, stride), ((pad, pad), (pad, pad)),
        dimension_numbers=("NHWC", "HWIO", "NHWC"),
        preferred_element_type=jnp.float32)
    return y + b.reshape(1, 1, 1, -1)


def pyramid_features_ref(inputs_nchw, params):
    # Mirrors the implementation's numerics: bf16 matmul inputs, f32 accumulation, and
    # bf16 storage of the inter-level lateral activations.
    C3, C4, C5 = [jnp.transpose(t, (0, 2, 3, 1)).astype(jnp.bfloat16) for t in inputs_nchw]

    def c1(x, w, b):
        return _conv_ref(x, w.reshape(1, 1, *w.shape), b, 1, 0)

    P5_x = c1(C5, params["P5_1_w"], params["P5_1_b"]).astype(jnp.bfloat16)
    P5_o = _conv_ref(P5_x, params["P5_2_w"], params["P5_2_b"], 1, 1)
    P4_x = (c1(C4, params["P4_1_w"], params["P4_1_b"])
            + upsample2x(P5_x)).astype(jnp.bfloat16)
    P4_o = _conv_ref(P4_x, params["P4_2_w"], params["P4_2_b"], 1, 1)
    P3_x = (c1(C3, params["P3_1_w"], params["P3_1_b"])
            + upsample2x(P4_x)).astype(jnp.bfloat16)
    P3_o = _conv_ref(P3_x, params["P3_2_w"], params["P3_2_b"], 1, 1)
    P6_o = _conv_ref(C5, params["P6_w"], params["P6_b"], 2, 1)
    P7_o = _conv_ref(jnp.maximum(P6_o, 0.0), params["P7_2_w"], params["P7_2_b"], 2, 1)
    return [jnp.transpose(t, (0, 3, 1, 2)) for t in (P3_o, P4_o, P5_o, P6_o, P7_o)]


# ---------------------------------- Main --------------------------------------------- #

if __name__ == "__main__":
    key = jax.random.PRNGKey(0)
    N = 2
    # feature_size = 128 keeps Cout lane-dense (unmasked stores, full MXU N dim).
    C3_size, C4_size, C5_size, feature_size = 32, 64, 128, 128

    k1, k2, k3, kp = jax.random.split(key, 4)
    # RetinaNet pyramid: C3 highest resolution, C5 lowest (strides 8/16/32).
    C3 = jax.random.normal(k1, (N, C3_size, 16, 16), jnp.float32)
    C4 = jax.random.normal(k2, (N, C4_size, 8, 8), jnp.float32)
    C5 = jax.random.normal(k3, (N, C5_size, 4, 4), jnp.float32)

    params = init_params(kp, C3_size, C4_size, C5_size, feature_size)

    outs = jax.block_until_ready(pyramid_features((C3, C4, C5), params))
    refs = pyramid_features_ref((C3, C4, C5), params)

    expected_shapes = [
        (N, feature_size, 16, 16),
        (N, feature_size, 8, 8),
        (N, feature_size, 4, 4),
        (N, feature_size, 2, 2),
        (N, feature_size, 1, 1),
    ]
    for o, r, s in zip(outs, refs, expected_shapes):
        assert o.shape == s, (o.shape, s)
        err = float(jnp.max(jnp.abs(o - r)))
        assert jnp.allclose(o, r, atol=2e-2, rtol=2e-2), err

    # Extra checks: exercise the multi-row-tile 3x3 path (halo DMA + double-buffered
    # prefetch + edge zeroing) for both strides, which the tiny FPN shapes above
    # (single row tile per image) don't reach at runtime.
    xt = jax.random.normal(jax.random.PRNGKey(7), (2, 16, 16, feature_size),
                           jnp.float32).astype(jnp.bfloat16)
    wt, bt = params["P3_2_w"], params["P3_2_b"]
    got1 = conv3x3(xt, wt, bt, stride=1, row_tile=4)
    want1 = _conv_ref(xt, wt, bt, 1, 1)
    assert jnp.allclose(got1, want1, atol=2e-2, rtol=2e-2), \
        float(jnp.max(jnp.abs(got1 - want1)))
    got2 = conv3x3(xt, wt, bt, stride=2, relu_input=True, row_tile=4)
    want2 = _conv_ref(jnp.maximum(xt, 0), wt, bt, 2, 1)
    assert jnp.allclose(got2, want2, atol=2e-2, rtol=2e-2), \
        float(jnp.max(jnp.abs(got2 - want2)))

    print("KERNEL_OK")
</pallas_src>

<mosaic_0001>
module attributes {stable_mosaic.version = 11 : i64} {
  func.func @_conv1x1_kernel(%arg0: i32, %arg1: i32, %arg2: memref<1x4x4x128xbf16, #tpu.memory_space<vmem>>, %arg3: memref<128x128xbf16, #tpu.memory_space<vmem>>, %arg4: memref<1x128xf32, #tpu.memory_space<vmem>>, %arg5: memref<1x4x4x128xbf16, #tpu.memory_space<vmem>>) attributes {dimension_semantics = [#tpu.dimension_semantics<parallel>, #tpu.dimension_semantics<parallel>], iteration_bounds = array<i64: 2, 1>, scalar_prefetch = 0 : i64, scratch_operands = 0 : i64, tpu.core_type = #tpu.core_type<tc>, window_params = [{transform_indices = @transform_0, window_bounds = array<i64: 1, 4, 4, 128>}, {pipeline_mode = #tpu.pipeline_mode<synchronous>, transform_indices = @transform_1, window_bounds = array<i64: 128, 128>}, {pipeline_mode = #tpu.pipeline_mode<synchronous>, transform_indices = @transform_2, window_bounds = array<i64: 1, 128>}, {transform_indices = @transform_3, window_bounds = array<i64: 1, 4, 4, 128>}]} {
    %c0 = arith.constant 0 : index
    %c0_0 = arith.constant 0 : index
    %c0_1 = arith.constant 0 : index
    %c0_2 = arith.constant 0 : index
    %0 = vector.load %arg2[%c0, %c0_0, %c0_1, %c0_2] : memref<1x4x4x128xbf16, #tpu.memory_space<vmem>>, vector<1x4x4x128xbf16>
    %1 = vector.shape_cast %0 : vector<1x4x4x128xbf16> to vector<4x4x128xbf16>
    %2 = vector.shape_cast %1 : vector<4x4x128xbf16> to vector<16x128xbf16>
    %c0_3 = arith.constant 0 : index
    %c0_4 = arith.constant 0 : index
    %3 = vector.load %arg3[%c0_3, %c0_4] : memref<128x128xbf16, #tpu.memory_space<vmem>>, vector<128x128xbf16>
    %cst = arith.constant dense<0.000000e+00> : vector<16x128xf32>
    %4 = tpu.matmul %2, %3, %cst {dimension_numbers = #tpu.dot_dimension_numbers<[1], [0], [0], [1], [0, 0, 1, 1], [], []>} : vector<16x128xbf16>, vector<128x128xbf16>, vector<16x128xf32> -> vector<16x128xf32>
    %c0_5 = arith.constant 0 : index
    %c0_6 = arith.constant 0 : index
    %5 = vector.load %arg4[%c0_5, %c0_6] : memref<1x128xf32, #tpu.memory_space<vmem>>, vector<1x128xf32>
    %6 = vector.broadcast %5 : vector<1x128xf32> to vector<16x128xf32>
    %7 = arith.addf %4, %6 : vector<16x128xf32>
    %8 = vector.shape_cast %7 : vector<16x128xf32> to vector<4x4x128xf32>
    %9 = arith.truncf %8 : vector<4x4x128xf32> to vector<4x4x128xbf16>
    %c0_7 = arith.constant 0 : index
    %c0_8 = arith.constant 0 : index
    %c0_9 = arith.constant 0 : index
    %c0_10 = arith.constant 0 : index
    %10 = vector.load %arg5[%c0_7, %c0_8, %c0_9, %c0_10] : memref<1x4x4x128xbf16, #tpu.memory_space<vmem>>, vector<1x4x4x128xbf16>
    %11 = vector.shape_cast %10 : vector<1x4x4x128xbf16> to vector<4x4x128xbf16>
    %12 = vector.shape_cast %9 : vector<4x4x128xbf16> to vector<1x4x4x128xbf16>
    tpu.vector_store %arg5[%c0_7, %c0_8, %c0_9, %c0_10], %12 {strides = array<i32>} : memref<1x4x4x128xbf16, #tpu.memory_space<vmem>>, vector<1x4x4x128xbf16>,
    return
  }
  func.func @transform_0(%arg0: i32, %arg1: i32) -> (i32, i32, i32, i32) {
    %c0_i32 = arith.constant 0 : i32
    %c0_i32_0 = arith.constant 0 : i32
    %c0_i32_1 = arith.constant 0 : i32
    return %arg0, %arg1, %c0_i32, %c0_i32_0 : i32, i32, i32, i32
  }
  func.func @transform_1(%arg0: i32, %arg1: i32) -> (i32, i32) {
    %c0_i32 = arith.constant 0 : i32
    %c0_i32_0 = arith.constant 0 : i32
    %c0_i32_1 = arith.constant 0 : i32
    return %c0_i32, %c0_i32_0 : i32, i32
  }
  func.func @transform_2(%arg0: i32, %arg1: i32) -> (i32, i32) {
    %c0_i32 = arith.constant 0 : i32
    %c0_i32_0 = arith.constant 0 : i32
    %c0_i32_1 = arith.constant 0 : i32
    return %c0_i32, %c0_i32_0 : i32, i32
  }
  func.func @transform_3(%arg0: i32, %arg1: i32) -> (i32, i32, i32, i32) {
    %c0_i32 = arith.constant 0 : i32
    %c0_i32_0 = arith.constant 0 : i32
    %c0_i32_1 = arith.constant 0 : i32
    return %arg0, %arg1, %c0_i32, %c0_i32_0 : i32, i32, i32, i32
  }
}

</mosaic_0001>

<bundles_post_ra>
// kernel: tpu_custom_call.1
= control target key start
LH: loop header
LB: loop body
LE: loop exit
PB: predicated region body
PF: predicated region fallthrough
CT: control target
= control target key end

     0   :  { %8 = vsyncpa [#allocation3], 0  ;;  %s1003_s0 = inlined_call_operand.hbm [shape: bf16[2,4,4,128], index: 0, kind: input, shape index: {}]   ;;  %s1004_s1 = inlined_call_operand.hbm [shape: bf16[128,128], index: 1, kind: input, shape index: {}]   ;;  %s1005_s2 = inlined_call_operand.vmem [shape: f32[1,128], index: 2, kind: input, shape index: {}]   ;;  %s1006_s3 = inlined_call_operand.hbm [shape: bf16[2,4,4,128], index: 3, kind: output, shape index: {}]  }
   0x1   :  { %10 = vsyncpa [#allocation3 + $0x1], 0 }
   0x2   :  { %11 = vsyncpa [#allocation6], 0 }
   0x3   :  { %12 = vsyncpa [#allocation4], 0 }
   0x4   :  { %14 = vsyncpa [#allocation4 + $0x1], 0  ;;  %s809_s12 = smov 0   ;;  %s811_s13 = smov 0  }
   0x5   :  { %s813_s14 = smov 0   ;;  %s815_s15 = smov 0  }
   0x6   :  { %s817_s16 = smov 0   ;;  %s819_s17 = smov 0  }
   0x7 LB: > { %s490_s18 = sadd.s32 4294967295, %s775_s17   ;;  %s491_s19 = sadd.s32 4294967294, %s775_s17   ;;  %s775_s17 = sphi %s819_s17, %s20_s17   ;;  %s771_s16 = sphi %s817_s16, %s1024_s16   ;;  %s767_s15 = sphi %s815_s15, %s1023_s15   ;;  %s763_s14 = sphi %s813_s14, %s1022_s14   ;;  %s759_s13 = sphi %s811_s13, %s1021_s13   ;;  %s755_s12 = sphi %s809_s12, %s1020_s12  }
   0x8   : > { %p54_p0 = scmp.ne.s32.totalorder %s759_s13, %s755_s12  ;;  %p843_p1 = scmp.eq.s32.totalorder %s490_s18, 0 }
   0x9   : > { %p847_p2 = scmp.eq.s32.totalorder %s490_s18, 1  ;;  %p128_p3 = scmp.eq.s32.totalorder %s491_s19, 1 }
   0xa   : > { %p853_p4 = por %p843_p1, %p54_p0  ;;  %p492_p5 = scmp.ge.s32.totalorder %s775_s17, 1 }
   0xb   : > { %p858_p6 = por %p128_p3, %p54_p0  ;;  %p135_p7 = scmp.lt.s32.totalorder %s775_s17, 3 }
   0xc   : > { %s1010_s22 = scalar_select %p853_p4, 1, 0 }
   0xd   : > { %s1011_s23 = scalar_select %p858_p6, 1, 0 }
   0xe   : > { %p863_p8 = pnand %p492_p5, %p135_p7  ;;  %s777_s25 = smov [#allocation5]  }
   0xf   : > { %s147_s26 = sshll.u32 %s777_s25, 4  ;;  %s32_s28 = sadd.s32 1, %s771_s16  ;;  %s148_s26 = int_to_ptr.vmem [resolvable:$true] %s147_s26 }
  0x10   : > { %p555_p9 = pneg %p863_p8  ;;  %s648_s29 = scalar_lea.vmem %s148_s26, 1024 }
  0x11   : > { %p649_p13 = scmp.ne.s32.totalorder %s148_s26, %s648_s29  ;;  %p656_p5 = scmp.lt.s32.totalorder %s148_s26, %s148_s26 }
  0x12   : > { %p872_p11 = pnand %p555_p9, %p843_p1  ;;  %p657_p7 = scmp.lt.s32.totalorder %s648_s29, %s648_s29 }
  0x14   : > { %p639_p12 = pneg %p872_p11  ;;  %p658_p6 = por %p657_p7, %p656_p5 }
  0x16   : > { %p651_p0 = pnand %p649_p13, %p639_p12 }
  0x18   : > { %p652_p3 = pneg %p651_p0 }
  0x1a   : > { %p659_p4 = pnand %p658_p6, %p652_p3 }
  0x1c   : > { %662 = shalt.err (!%p659_p4)
}
  0x1d   : > { %s778_s30 = smov 64   ;;  %s779_s4 = smov 4  }
  0x1e   : > { %558 = dma.hbm_to_vmem [thread:$0]  (!%p872_p11), %s1004_s1, 1024, %s148_s26, [#allocation6], %s778_s30, %s778_s30, %s779_s4  }
  0x1f   : > { %p34_p6 = scmp.ge.s32.totalorder %s32_s28, 2  ;;  %s41_s7 = sadd.s32 1, %s763_s14 }
  0x20   : > { %p48_p4 = scmp.ne.s32.totalorder %s763_s14, %s759_s13  ;;  %p49_p9 = scmp.eq.s32.totalorder %s775_s17, 0 }
  0x21   : > { %s1026_s28 = smov (%p34_p6, %s32_s28), 0  ;;  %p568_p0 = scmp.lt.s32.totalorder %s775_s17, 2 }
  0x22   : > { %p890_p12 = por %p49_p9, %p48_p4  ;;  %p896_p13 = por %p847_p2, %p48_p4 }
  0x23   : > { %s36_s10 = ssub.s32 %s771_s16, %s1026_s28  ;;  %s164_s11 = sand.u32 1, %s763_s14  }
  0x24   : > { %p39_p11 = scmp.eq.s32.totalorder %s36_s10, 0  ;;  %s495_s18 = sshll.u32 %s164_s11, 3 }
  0x25   : > { %s516_s25 = sshll.u32 %s771_s16, 7  ;;  %s168_s30 = scalar_lea.vmem [#allocation2], %s495_s18 }
  0x26   : > { %s905_s19 = scalar_select %p39_p11, %s763_s14, %s41_s7  }
  0x27   : > { %s176_s29 = scalar_lea.hbm %s1003_s0, %s516_s25  ;;  %s177_s4 = sshll.u32 %s168_s30, 4  ;;  %s178_s4 = int_to_ptr.vmem [resolvable:$true] %s177_s4 }
  0x28   : > { %p913_p2 = pnand %p568_p0, %p890_p12  ;;  %s165_s5 = scalar_lea.sflag [#allocation3], %s164_s11 }
  0x29   : > { %s676_s6 = scalar_lea.vmem %s178_s4, 128  ;;  %s780_s7 = smov [#allocation2]  }
  0x2a   : > { %p665_p3 = pneg %p913_p2  ;;  %p677_p5 = scmp.ne.s32.totalorder %s178_s4, %s676_s6 }
  0x2b   : > { %s681_s10 = sshll.u32 %s780_s7, 4  ;;  %s682_s10 = int_to_ptr.vmem [resolvable:$false] %s681_s10 }
  0x2c   : > { %p679_p7 = pnand %p677_p5, %p665_p3  ;;  %s683_s25 = scalar_lea.vmem %s682_s10, 256 }
  0x2d   : > { %p684_p4 = scmp.lt.s32.totalorder %s178_s4, %s682_s10  ;;  %p685_p9 = scmp.lt.s32.totalorder %s683_s25, %s676_s6 }
  0x2e   : > { %p680_p6 = pneg %p679_p7 }
  0x2f   : > { %p686_p11 = por %p685_p9, %p684_p4 }
  0x31   : > { %p687_p10 = pnand %p686_p11, %p680_p6 }
  0x33   : > { %690 = shalt.err (!%p687_p10)
}
  0x34   : > { %s781_s8 = smov 32   ;;  %s782_s18 = smov 2  }
  0x35   : > { %562 = dma.hbm_to_vmem [thread:$0]  (!%p913_p2), %s176_s29, 128, %s178_s4, %s165_s5, %s781_s8, %s781_s8, %s782_s18  }
  0x36   : > { %189 = sbr.rel (%p863_p8) target bundleno = 312 (0x138), region = 32  ;;  %s924_s11 = sand.u32 (!%p863_p8), 1, %s759_s13  }
  0x37   : > { %s499_s26 = sshll.u32 (!%p863_p8), %s924_s11, 3  ;;  %s192_s27 = scalar_lea.sflag (!%p863_p8), [#allocation3], %s924_s11 }
  0x38   : > { %s930_s30 = scalar_lea.vmem (!%p863_p8), [#allocation2], %s499_s26  ;;  %p1017_p10 = scmp.ne.s32.totalorder (!%p863_p8), %s1010_s22, 0 }
  0x3b   : > { %742 = dma.done.wait (%p1017_p10), %s192_s27, 128  }
  0x3c   : > { %744 = vsyncadd (%p1017_p10), %s192_s27, 4294967168 }
  0x3d   : > { %746 = dma.done.wait (%p843_p1), [#allocation6], 1024  }
  0x3e   : > { %748 = vsyncadd (%p843_p1), [#allocation6], 4294966272  ;;  %v783_v0 = vmov 0.0   ;;  %vm784_vm0 = vmmov 0   ;;  %v629_v1 = vld [vmem:[#allocation5 + $0x38] sm:$0xff]   ;;  %v630_v2 = vld [vmem:[#allocation5 + $0x30] sm:$0xff]   ;;  %v261_v7 = vlaneseq }
  0x3f   : > { %527 = vmatprep.subr.bf16.mxu0 %v783_v0  ;;  %543 = vmatprep.mubr.msk.bf16.mxu0 %vm784_vm0, %v783_v0  ;;  %v631_v3 = vld [vmem:[#allocation5 + $0x28] sm:$0xff]   ;;  %v632_v4 = vld [vmem:[#allocation5 + $0x20] sm:$0xff]   ;;  %v785_v5 = vmov 1983009808   ;;  %v633_v8 = vld [vmem:[#allocation5 + $0x18] sm:$0xff]   ;;  %s221_s24 = scalar_lea.vmem [#allocation7], %s499_s26 }
  0x40   : > { %528 = vmatpush3.bf16.msra.mxu0 %v629_v1  ;;  %v259_v6 = vunpack.c.l.s4 %v785_v5  ;;  %v634_v9 = vld [vmem:[#allocation5 + $0x10] sm:$0xff]   ;;  %v262_v12 = vshrl.u32 %v261_v7, 7  ;;  %v635_v19 = vld [vmem:[#allocation5 + $0x8] sm:$0xff]   ;;  %v636_v22 = vld [vmem:[#allocation5] sm:$0xff]   ;;  %s393_s29 = sshll.u32 %s221_s24, 4  ;;  %s517_s4 = sshll.u32 %s767_s15, 7  ;;  %s950_s29 = int_to_ptr.vmem [resolvable:$true] %s393_s29 }
  0x41   : > { %529 = vmatprep.subr.bf16.mxu0 %v783_v0  ;;  %v225_v10 = vld [vmem:[%s930_s30] sm:$0x3]  ;;  %v226_v13 = vld [vmem:[%s930_s30 + $0x2] sm:$0x3]  ;;  %v227_v14 = vld [vmem:[%s930_s30 + $0x4] sm:$0x3]  ;;  %s955_s6 = scalar_lea.hbm %s1006_s3, %s517_s4 }
  0x42   : > { %v260_v11 = vunpack.c.0.s8 %v259_v6  ;;  %v228_v15 = vld [vmem:[%s930_s30 + $0x6] sm:$0x3]  ;;  %v256_v16 = vcombine.low %v225_v10, %v226_v13  ;;  %v502_v24 = vld [vmem:[%s1005_s2] ss:$0 sm:$0xff]  ;;  %s378_s7 = scalar_lea.sflag [#allocation4], %s924_s11  ;;  %s691_s10 = scalar_lea.vmem %s950_s29, 128 }
  0x43   : > { %v257_v17 = vcombine.low %v227_v14, %v228_v15  ;;  %p692_p1 = scmp.ne.s32.totalorder %s950_s29, %s691_s10  ;;  %s786_s15 = smov [#allocation7]  }
  0x44   : > { %530 = vmatpush3.bf16.msra.mxu0 %v630_v2  ;;  %v263_v18 = vsub.s32 %v260_v11, %v262_v12  ;;  %s695_s25 = sshll.u32 %s786_s15, 4  ;;  %s696_s25 = int_to_ptr.vmem [resolvable:$false] %s695_s25 }
  0x45   : > { %531 = vmatprep.subr.bf16.mxu0 %v783_v0  ;;  %p693_p8 = pnand %p692_p1, %p896_p13  ;;  %s697_s8 = scalar_lea.vmem %s696_s25, 256 }
  0x46   : > { %v264_v20 = vrot.slane %v256_v16, %v263_v18  ;;  %v271_v21 = vrot.slane %v257_v17, %v263_v18  ;;  %p698_p0 = scmp.lt.s32.totalorder %s950_s29, %s696_s25  ;;  %p699_p2 = scmp.lt.s32.totalorder %s697_s8, %s691_s10 }
  0x47   : > { %p694_p12 = pneg %p693_p8 }
  0x48   : > { %532 = vmatpush3.bf16.msra.mxu0 %v631_v3  ;;  %v272_v23 = vcombine.low %v264_v20, %v271_v21  ;;  %p700_p3 = por %p699_p2, %p698_p0 }
  0x49   : > { %533 = vmatprep.subr.bf16.mxu0 %v783_v0 }
  0x4a   : > { %p701_p5 = pnand %p700_p3, %p694_p12 }
  0x4c   : > { %534 = vmatpush3.bf16.msra.mxu0 %v632_v4 }
  0x4d   : > { %535 = vmatprep.subr.bf16.mxu0 %v783_v0 }
  0x50   : > { %536 = vmatpush3.bf16.msra.mxu0 %v633_v8 }
  0x51   : > { %537 = vmatprep.subr.bf16.mxu0 %v783_v0 }
  0x54   : > { %538 = vmatpush3.bf16.msra.mxu0 %v634_v9 }
  0x55   : > { %539 = vmatprep.subr.bf16.mxu0 %v783_v0 }
  0x58   : > { %540 = vmatpush3.bf16.msra.mxu0 %v635_v19 }
  0x59   : > { %541 = vmatprep.subr.bf16.mxu0 %v783_v0 }
  0x5c   : > { %542 = vmatpush3.bf16.msra.mxu0 %v636_v22 }
  0x5f   : > { %544 = vmatmul.mubr.bf16.vlgmr.msra.gmra.mxu0 %v272_v23 }
 0x11f   : > { %v356_v25 = vpop.f32.mrf.mxu0 }
 0x120   : > { %v357_v26 = vadd.f32 %v502_v24, %v356_v25 }
 0x121   : > { %v545_v27 = vpop.f32.mrf.mxu0 }
 0x122   : > { %v365_v28 = vcombine.high %v357_v26, %v357_v26  ;;  %v369_v29 = vpack.c.bf16 %v357_v26, %v357_v26 }
 0x123   : > { %v359_v30 = vpop.f32.mrf.mxu0 }
 0x124   : > { %v370_v31 = vpack.c.bf16 %v365_v28, %v365_v28  ;;  %373 = vst [vmem:[%s221_s24] sm:$0x3] %v369_v29  ;;  %v360_v32 = vadd.f32 %v502_v24, %v359_v30 }
 0x125   : > { %v546_v33 = vpop.f32.mrf.mxu0 }
 0x126   : > { %374 = vst [vmem:[%s221_s24 + $0x2] sm:$0x3] %v370_v31  ;;  %v366_v34 = vcombine.high %v360_v32, %v360_v32  ;;  %v371_v35 = vpack.c.bf16 %v360_v32, %v360_v32 }
 0x128   : > { %v372_v36 = vpack.c.bf16 %v366_v34, %v366_v34  ;;  %375 = vst [vmem:[%s221_s24 + $0x4] sm:$0x3] %v371_v35 }
 0x12a   : > { %376 = vst [vmem:[%s221_s24 + $0x6] sm:$0x3] %v372_v36 }
 0x12b   : > { %704 = shalt.err (!%p701_p5)
}
 0x12c   : > { %s705_s18 = scalar_lea.hbm %s955_s6, 128  ;;  %s709_s30 = scalar_lea.hbm %s1006_s3, 256 }
 0x12d   : > { %p706_p7 = scmp.ne.s32.totalorder %s955_s6, %s705_s18  ;;  %p710_p9 = scmp.lt.s32.totalorder %s955_s6, %s1006_s3 }
 0x12e   : > { %p711_p11 = scmp.lt.s32.totalorder %s709_s30, %s705_s18 }
 0x12f   : > { %p707_p6 = pnand %p706_p7, %p896_p13 }
 0x130   : > { %p712_p10 = por %p711_p11, %p710_p9 }
 0x131   : > { %p708_p4 = pneg %p707_p6 }
 0x133   : > { %p713_p1 = pnand %p712_p10, %p708_p4 }
 0x135   : > { %716 = shalt.err (!%p713_p1)
}
 0x136   : > { %s787_s24 = smov 32   ;;  %s788_s4 = smov 2  }
 0x137   : > { %553 = dma.vmem_to_hbm [thread:$0]  (%p896_p13), %s950_s29, 128, %s955_s6, %s378_s7, %s787_s24, %s787_s24, %s788_s4  }
 0x138 PF: > { %s408_s21 = sand.u32 1, %s755_s12   ;;  %p1018_p8 = scmp.ne.s32.totalorder %s1011_s23, 0 }
 0x139   : > { %p1019_p12 = scmp.ge.s32.totalorder %s775_s17, 2  ;;  %s409_s5 = scalar_lea.sflag [#allocation4], %s408_s21 }
 0x13b   : > { %p564_p0 = pnand %p1019_p12, %p1018_p8 }
 0x13d   : > { %p565_p2 = pneg %p564_p0 }
 0x13f   : > { %750 = dma.done.wait (%p565_p2), %s409_s5, 128  }
 0x140   : > { %752 = vsyncadd (%p565_p2), %s409_s5, 4294967168  ;;  %s20_s17 = sadd.s32 1, %s775_s17   ;;  %s1020_s12 = smov %s759_s13 }
 0x141   : > { %p17_p3 = scmp.ge.s32.totalorder %s20_s17, 4   ;;  %s1021_s13 = smov %s763_s14 }
 0x142   : > { %s1022_s14 = smov %s905_s19  ;;  %s1023_s15 = smov %s771_s16 }
 0x143   : > { %s1024_s16 = smov %s1026_s28  ;;  %19 = sbr.rel (!%p17_p3) target bundleno = 7 (0x7), region = 81 }
 0x148   :  { %414 = vsyncpa [#allocation3], 1 }
 0x149   :  { %416 = vsyncpa [#allocation3 + $0x1], 1 }
 0x14a   :  { %417 = vsyncpa [#allocation6], 1 }
 0x14b   :  { %418 = vsyncpa [#allocation4], 1 }
 0x14c   :  { %420 = vsyncpa [#allocation4 + $0x1], 1 }

</bundles_post_ra>
